<compile_context>
chip_gen: v7x
topology: tpu7x:2x2x1
jax: 0.10.0
libtpu: 0.0.40
codegen_flags: <defaults>
</compile_context>

<pallas_src>
import functools

import jax
import jax.numpy as jnp
from jax.experimental import pallas as pl
from jax.experimental.pallas import tpu as pltpu

_SUB = 256  # in-kernel batch sub-chunk (lanes per matmul pass); multiple of 128


def _round_up(n, m):
    return ((n + m - 1) // m) * m


def _ae_kernel(x_ref, w_ref, b_ref, o_ref, *, dims, offs, sub, n_sub):
    """Full encoder+decoder forward on one (block_b, P) batch-row tile.

    dims = (P, 64, 32, 16, 32, 64, P); offs[l] = row offset of layer l inside
    the packed weight/bias blobs.  Batch is moved onto the lane axis in-kernel
    so every matmul output is lane-dense.
    """
    # Weights are tiny (< 70 KiB total, already in the dot dtype): load once
    # per grid step and reuse for every sub-chunk.
    ws = []
    for li in range(6):
        r0, out_d, in_d = offs[li], dims[li + 1], dims[li]
        ws.append(w_ref[r0:r0 + out_d, 0:in_d])

    for c in range(n_sub):  # static, fully unrolled
        rows = slice(c * sub, (c + 1) * sub)
        # (sub, P) row block -> (P, sub): batch on lanes, features on sublanes.
        h = jnp.transpose(x_ref[rows, :])
        for li in range(6):
            r0, out_d = offs[li], dims[li + 1]
            # (out, in) @ (in, sub) -> (out, sub), f32 accumulation on the MXU.
            h = jnp.dot(ws[li], h.astype(ws[li].dtype),
                        preferred_element_type=jnp.float32)
            h = h + b_ref[r0:r0 + out_d, :]          # (out, 1) lane-broadcast bias
            h = jnp.maximum(h, 0.0) if li < 5 else jax.nn.sigmoid(h)
        # (P, sub) -> (sub, P) and store into the row-major output tile.
        o_ref[rows, :] = jnp.transpose(h).astype(o_ref.dtype)


def init_params(key, num_properties, dtype=jnp.float32):
    """PyTorch-style init: W is (out, in), b is (out,), U(-1/sqrt(fan_in), +)."""
    dims = [num_properties, 64, 32, 16, 32, 64, num_properties]
    params = []
    for i in range(6):
        fan_in, fan_out = dims[i], dims[i + 1]
        key, kw, kb = jax.random.split(key, 3)
        bound = 1.0 / float(fan_in) ** 0.5
        w = jax.random.uniform(kw, (fan_out, fan_in), dtype, -bound, bound)
        b = jax.random.uniform(kb, (fan_out,), dtype, -bound, bound)
        params.append((w, b))
    return params


def _pack_params(params, dot_dtype):
    """Pack the 6 (out, in) weights / (out,) biases into two small arrays.

    Layer l occupies rows [offs[l], offs[l]+out_l); weights are left-aligned in
    the lane axis.  Row offsets (0, 64, 96, 112, 144, 208) are all multiples of
    16, so static row slices stay sublane-tile aligned even for bf16 packing.
    """
    offs, r = [], 0
    for w, _ in params:
        offs.append(r)
        r += w.shape[0]
    rows = _round_up(r, 16)
    cols = max(w.shape[1] for w, _ in params)
    wpack = jnp.zeros((rows, cols), dot_dtype)
    bpack = jnp.zeros((rows, 1), jnp.float32)
    for (w, b), r0 in zip(params, offs):
        wpack = wpack.at[r0:r0 + w.shape[0], :w.shape[1]].set(w.astype(dot_dtype))
        bpack = bpack.at[r0:r0 + w.shape[0], 0].set(b.astype(jnp.float32))
    return wpack, bpack, tuple(offs)


@functools.partial(jax.jit, static_argnames=("block_b", "use_bf16_dot"))
def _forward_impl(x, params, block_b, use_bf16_dot):
    B, P = x.shape
    dims = (P,) + tuple(w.shape[0] for w, _ in params)
    dot_dtype = jnp.bfloat16 if use_bf16_dot else jnp.float32
    wpack, bpack, offs = _pack_params(params, dot_dtype)

    blk = block_b
    sub = min(_SUB, blk)
    n_sub = blk // sub                      # blk is a multiple of sub (wrapper)
    grid = (pl.cdiv(B, blk),)               # no jnp.pad: tail block is clipped

    flops = 2 * B * sum(dims[i] * dims[i + 1] for i in range(6))
    bytes_accessed = (2 * B * P * x.dtype.itemsize
                      + wpack.size * wpack.dtype.itemsize
                      + bpack.size * bpack.dtype.itemsize)

    kernel = functools.partial(_ae_kernel, dims=dims, offs=offs,
                               sub=sub, n_sub=n_sub)

    return pl.pallas_call(
        kernel,
        out_shape=jax.ShapeDtypeStruct((B, P), x.dtype),
        grid=grid,
        in_specs=[
            pl.BlockSpec((blk, P), lambda i: (i, 0)),      # x row block
            pl.BlockSpec(wpack.shape, lambda i: (0, 0)),   # packed weights (VMEM-resident)
            pl.BlockSpec(bpack.shape, lambda i: (0, 0)),   # packed biases   (VMEM-resident)
        ],
        out_specs=pl.BlockSpec((blk, P), lambda i: (i, 0)),
        compiler_params=pltpu.CompilerParams(
            # Batch axis is embarrassingly parallel (megacore sharding on v7x).
            dimension_semantics=("parallel",),
            # Even at block_b=8192 the double-buffered in/out tiles (lane-padded)
            # plus params stay well under this; 48 MiB fits v7x's 64 MiB VMEM.
            vmem_limit_bytes=48 << 20,
        ),
        cost_estimate=pl.CostEstimate(
            flops=flops, transcendentals=B * P, bytes_accessed=bytes_accessed),
    )(x, wpack, bpack)


def autoencoder_forward(x, params, block_b=2048, use_bf16_dot=True):
    """x: (B, num_properties) -> (B, num_properties).

    block_b = batch rows per grid step; sweep 2048/4096/8192 for large B
    (bigger tiles amortize the ~0.35 us per-grid-step cost; the in-kernel
    256-lane sub-chunk loop keeps vreg pressure bounded regardless).
    """
    B = x.shape[0]
    blk = max(8, min(int(block_b), _round_up(B, 8)))   # shrink for small batches
    if blk > _SUB:
        blk = _round_up(blk, _SUB)                     # sub-chunk loop needs blk % _SUB == 0
    return _forward_impl(x, params, blk, use_bf16_dot)


def _reference_forward(x, params):
    h = x
    for idx in range(5):
        w, b = params[idx]
        h = jnp.maximum(h @ w.T + b, 0.0)
    w, b = params[5]
    return jax.nn.sigmoid(h @ w.T + b)


if __name__ == "__main__":
    num_properties = 8
    batch = 16

    key = jax.random.PRNGKey(0)
    key, kx = jax.random.split(key)
    x = jax.random.normal(kx, (batch, num_properties), dtype=jnp.float32)
    params = init_params(key, num_properties)

    out = autoencoder_forward(x, params)      # blk auto-shrinks to 16 for B=16
    out = jax.block_until_ready(out)

    ref = _reference_forward(x, params)
    assert out.shape == (batch, num_properties)
    # bf16 MXU operands vs f32 reference: sigmoid outputs agree to ~1e-3.
    assert jnp.allclose(out, ref, atol=3e-2, rtol=3e-2), \
        float(jnp.max(jnp.abs(out - ref)))

    print("KERNEL_OK")
</pallas_src>

<mosaic_0001>
module attributes {stable_mosaic.version = 11 : i64} {
  func.func @_ae_kernel(%arg0: i32, %arg1: memref<16x8xf32, #tpu.memory_space<vmem>>, %arg2: memref<224x64xbf16, #tpu.memory_space<vmem>>, %arg3: memref<224x1xf32, #tpu.memory_space<vmem>>, %arg4: memref<16x8xf32, #tpu.memory_space<vmem>>) attributes {dimension_semantics = [#tpu.dimension_semantics<parallel>], iteration_bounds = array<i64: 1>, scalar_prefetch = 0 : i64, scratch_operands = 0 : i64, tpu.core_type = #tpu.core_type<tc>, window_params = [{transform_indices = @transform_0, window_bounds = array<i64: 16, 8>}, {pipeline_mode = #tpu.pipeline_mode<synchronous>, transform_indices = @transform_1, window_bounds = array<i64: 224, 64>}, {pipeline_mode = #tpu.pipeline_mode<synchronous>, transform_indices = @transform_2, window_bounds = array<i64: 224, 1>}, {transform_indices = @transform_3, window_bounds = array<i64: 16, 8>}]} {
    %c0 = arith.constant 0 : index
    %c0_0 = arith.constant 0 : index
    %0 = vector.load %arg2[%c0, %c0_0] : memref<224x64xbf16, #tpu.memory_space<vmem>>, vector<64x8xbf16>
    %c64 = arith.constant 64 : index
    %c0_1 = arith.constant 0 : index
    %1 = vector.load %arg2[%c64, %c0_1] : memref<224x64xbf16, #tpu.memory_space<vmem>>, vector<32x64xbf16>
    %c96 = arith.constant 96 : index
    %c0_2 = arith.constant 0 : index
    %2 = vector.load %arg2[%c96, %c0_2] : memref<224x64xbf16, #tpu.memory_space<vmem>>, vector<16x32xbf16>
    %c112 = arith.constant 112 : index
    %c0_3 = arith.constant 0 : index
    %3 = vector.load %arg2[%c112, %c0_3] : memref<224x64xbf16, #tpu.memory_space<vmem>>, vector<32x16xbf16>
    %c144 = arith.constant 144 : index
    %c0_4 = arith.constant 0 : index
    %4 = vector.load %arg2[%c144, %c0_4] : memref<224x64xbf16, #tpu.memory_space<vmem>>, vector<64x32xbf16>
    %c208 = arith.constant 208 : index
    %c0_5 = arith.constant 0 : index
    %5 = vector.load %arg2[%c208, %c0_5] : memref<224x64xbf16, #tpu.memory_space<vmem>>, vector<8x64xbf16>
    %c0_6 = arith.constant 0 : index
    %c0_7 = arith.constant 0 : index
    %6 = vector.load %arg1[%c0_6, %c0_7] : memref<16x8xf32, #tpu.memory_space<vmem>>, vector<16x8xf32>
    %7 = tpu.transpose %6, [1, 0] : vector<16x8xf32> -> vector<8x16xf32>
    %8 = arith.truncf %7 : vector<8x16xf32> to vector<8x16xbf16>
    %cst = arith.constant dense<0.000000e+00> : vector<64x16xf32>
    %9 = tpu.matmul %0, %8, %cst {dimension_numbers = #tpu.dot_dimension_numbers<[1], [0], [0], [1], [0, 0, 1, 1], [], []>} : vector<64x8xbf16>, vector<8x16xbf16>, vector<64x16xf32> -> vector<64x16xf32>
    %c0_8 = arith.constant 0 : index
    %c0_9 = arith.constant 0 : index
    %10 = vector.load %arg3[%c0_8, %c0_9] : memref<224x1xf32, #tpu.memory_space<vmem>>, vector<64x1xf32>
    %11 = vector.broadcast %10 : vector<64x1xf32> to vector<64x16xf32>
    %12 = arith.addf %9, %11 : vector<64x16xf32>
    %cst_10 = arith.constant 0.000000e+00 : f32
    %13 = vector.broadcast %cst_10 : f32 to vector<64x16xf32>
    %14 = arith.maximumf %12, %13 : vector<64x16xf32>
    %15 = arith.truncf %14 : vector<64x16xf32> to vector<64x16xbf16>
    %cst_11 = arith.constant dense<0.000000e+00> : vector<32x16xf32>
    %16 = tpu.matmul %1, %15, %cst_11 {dimension_numbers = #tpu.dot_dimension_numbers<[1], [0], [0], [1], [0, 0, 1, 1], [], []>} : vector<32x64xbf16>, vector<64x16xbf16>, vector<32x16xf32> -> vector<32x16xf32>
    %c64_12 = arith.constant 64 : index
    %c0_13 = arith.constant 0 : index
    %17 = vector.load %arg3[%c64_12, %c0_13] : memref<224x1xf32, #tpu.memory_space<vmem>>, vector<32x1xf32>
    %18 = vector.broadcast %17 : vector<32x1xf32> to vector<32x16xf32>
    %19 = arith.addf %16, %18 : vector<32x16xf32>
    %cst_14 = arith.constant 0.000000e+00 : f32
    %20 = vector.broadcast %cst_14 : f32 to vector<32x16xf32>
    %21 = arith.maximumf %19, %20 : vector<32x16xf32>
    %22 = arith.truncf %21 : vector<32x16xf32> to vector<32x16xbf16>
    %cst_15 = arith.constant dense<0.000000e+00> : vector<16x16xf32>
    %23 = tpu.matmul %2, %22, %cst_15 {dimension_numbers = #tpu.dot_dimension_numbers<[1], [0], [0], [1], [0, 0, 1, 1], [], []>} : vector<16x32xbf16>, vector<32x16xbf16>, vector<16x16xf32> -> vector<16x16xf32>
    %c96_16 = arith.constant 96 : index
    %c0_17 = arith.constant 0 : index
    %24 = vector.load %arg3[%c96_16, %c0_17] : memref<224x1xf32, #tpu.memory_space<vmem>>, vector<16x1xf32>
    %25 = vector.broadcast %24 : vector<16x1xf32> to vector<16x16xf32>
    %26 = arith.addf %23, %25 : vector<16x16xf32>
    %cst_18 = arith.constant 0.000000e+00 : f32
    %27 = vector.broadcast %cst_18 : f32 to vector<16x16xf32>
    %28 = arith.maximumf %26, %27 : vector<16x16xf32>
    %29 = arith.truncf %28 : vector<16x16xf32> to vector<16x16xbf16>
    %cst_19 = arith.constant dense<0.000000e+00> : vector<32x16xf32>
    %30 = tpu.matmul %3, %29, %cst_19 {dimension_numbers = #tpu.dot_dimension_numbers<[1], [0], [0], [1], [0, 0, 1, 1], [], []>} : vector<32x16xbf16>, vector<16x16xbf16>, vector<32x16xf32> -> vector<32x16xf32>
    %c112_20 = arith.constant 112 : index
    %c0_21 = arith.constant 0 : index
    %31 = vector.load %arg3[%c112_20, %c0_21] : memref<224x1xf32, #tpu.memory_space<vmem>>, vector<32x1xf32>
    %32 = vector.broadcast %31 : vector<32x1xf32> to vector<32x16xf32>
    %33 = arith.addf %30, %32 : vector<32x16xf32>
    %cst_22 = arith.constant 0.000000e+00 : f32
    %34 = vector.broadcast %cst_22 : f32 to vector<32x16xf32>
    %35 = arith.maximumf %33, %34 : vector<32x16xf32>
    %36 = arith.truncf %35 : vector<32x16xf32> to vector<32x16xbf16>
    %cst_23 = arith.constant dense<0.000000e+00> : vector<64x16xf32>
    %37 = tpu.matmul %4, %36, %cst_23 {dimension_numbers = #tpu.dot_dimension_numbers<[1], [0], [0], [1], [0, 0, 1, 1], [], []>} : vector<64x32xbf16>, vector<32x16xbf16>, vector<64x16xf32> -> vector<64x16xf32>
    %c144_24 = arith.constant 144 : index
    %c0_25 = arith.constant 0 : index
    %38 = vector.load %arg3[%c144_24, %c0_25] : memref<224x1xf32, #tpu.memory_space<vmem>>, vector<64x1xf32>
    %39 = vector.broadcast %38 : vector<64x1xf32> to vector<64x16xf32>
    %40 = arith.addf %37, %39 : vector<64x16xf32>
    %cst_26 = arith.constant 0.000000e+00 : f32
    %41 = vector.broadcast %cst_26 : f32 to vector<64x16xf32>
    %42 = arith.maximumf %40, %41 : vector<64x16xf32>
    %43 = arith.truncf %42 : vector<64x16xf32> to vector<64x16xbf16>
    %cst_27 = arith.constant dense<0.000000e+00> : vector<8x16xf32>
    %44 = tpu.matmul %5, %43, %cst_27 {dimension_numbers = #tpu.dot_dimension_numbers<[1], [0], [0], [1], [0, 0, 1, 1], [], []>} : vector<8x64xbf16>, vector<64x16xbf16>, vector<8x16xf32> -> vector<8x16xf32>
    %c208_28 = arith.constant 208 : index
    %c0_29 = arith.constant 0 : index
    %45 = vector.load %arg3[%c208_28, %c0_29] : memref<224x1xf32, #tpu.memory_space<vmem>>, vector<8x1xf32>
    %46 = vector.broadcast %45 : vector<8x1xf32> to vector<8x16xf32>
    %47 = arith.addf %44, %46 : vector<8x16xf32>
    %48 = arith.negf %47 : vector<8x16xf32>
    %49 = math.exp %48 : vector<8x16xf32>
    %cst_30 = arith.constant 1.000000e+00 : f32
    %50 = vector.broadcast %cst_30 : f32 to vector<8x16xf32>
    %51 = arith.addf %50, %49 : vector<8x16xf32>
    %52 = arith.divf %50, %51 : vector<8x16xf32>
    %53 = tpu.transpose %52, [1, 0] : vector<8x16xf32> -> vector<16x8xf32>
    %c0_31 = arith.constant 0 : index
    %c0_32 = arith.constant 0 : index
    %54 = vector.load %arg4[%c0_31, %c0_32] : memref<16x8xf32, #tpu.memory_space<vmem>>, vector<16x8xf32>
    tpu.vector_store %arg4[%c0_31, %c0_32], %53 {strides = array<i32>} : memref<16x8xf32, #tpu.memory_space<vmem>>, vector<16x8xf32>,
    return
  }
  func.func @transform_0(%arg0: i32) -> (i32, i32) {
    %c0_i32 = arith.constant 0 : i32
    %c0_i32_0 = arith.constant 0 : i32
    return %arg0, %c0_i32 : i32, i32
  }
  func.func @transform_1(%arg0: i32) -> (i32, i32) {
    %c0_i32 = arith.constant 0 : i32
    %c0_i32_0 = arith.constant 0 : i32
    %c0_i32_1 = arith.constant 0 : i32
    return %c0_i32, %c0_i32_0 : i32, i32
  }
  func.func @transform_2(%arg0: i32) -> (i32, i32) {
    %c0_i32 = arith.constant 0 : i32
    %c0_i32_0 = arith.constant 0 : i32
    %c0_i32_1 = arith.constant 0 : i32
    return %c0_i32, %c0_i32_0 : i32, i32
  }
  func.func @transform_3(%arg0: i32) -> (i32, i32) {
    %c0_i32 = arith.constant 0 : i32
    %c0_i32_0 = arith.constant 0 : i32
    return %arg0, %c0_i32 : i32, i32
  }
}

</mosaic_0001>

<bundles_post_ra>
// kernel: _forward_impl.1
= control target key start
LH: loop header
LB: loop body
LE: loop exit
PB: predicated region body
PF: predicated region fallthrough
CT: control target
= control target key end

     0   :  { %vm145_vm0 = vcmask 64512   ;;  %v885_v3 = vmov 0   ;;  %vm158_vm1 = vcmask 1043456   ;;  %vm273_vm2 = vcmask 523264   ;;  %s1069_s0 = inlined_call_operand.vmem [shape: f32[16,8], index: 0, kind: input, shape index: {}]   ;;  %s1070_s1 = inlined_call_operand.vmem [shape: bf16[224,64], index: 1, kind: input, shape index: {}]   ;;  %s1071_s2 = inlined_call_operand.vmem [shape: f32[224,1], index: 2, kind: input, shape index: {}]   ;;  %s1072_s3 = inlined_call_operand.vmem [shape: f32[16,8], index: 3, kind: output, shape index: {}]  }
   0x1   :  { %v42_v0 = vld [vmem:[%s1069_s0] sm:$0xff]  ;;  %v43_v1 = vld [vmem:[%s1069_s0 + $0x8] sm:$0xff]  ;;  %866 = vset.pattern.permute.xlu1 %v885_v3  ;;  %v80_v6 = vld [vmem:[%s1071_s2 + $0x18] sm:$0xff]  ;;  %vm887_vm3 = vmmov 0   ;;  %vm352_vm4 = vcmask 261120   ;;  %vm434_vm5 = vcmask 130048  }
   0x2   :  { %44 = vxpose.xlu0.b32.start [1/2] (short) (narrow) %v42_v0, 8  ;;  %v868_v2 = vld [vmem:[%s1070_s1] sm:$0xff]   ;;  %v78_v5 = vld [vmem:[%s1071_s2 + $0x8] sm:$0xff]  ;;  %v83_v9 = vld [vmem:[%s1071_s2 + $0x30] sm:$0xff] }
   0x3   :  { %804 = vmatprep.mubr.msk.bf16.mxu0 %vm145_vm0, %v868_v2  ;;  %v77_v4 = vld [vmem:[%s1071_s2] sm:$0xff]  ;;  %v82_v8 = vld [vmem:[%s1071_s2 + $0x28] sm:$0xff]  ;;  %v84_v10 = vld [vmem:[%s1071_s2 + $0x38] sm:$0xff] }
   0x4   :  { %87 = vperm.xlu1 %866, %v77_v4   ;;  %v81_v7 = vld [vmem:[%s1071_s2 + $0x20] sm:$0xff]  ;;  %v240_v12 = vld [vmem:[%s1071_s2 + $0x48] sm:$0xff]  ;;  %v241_v13 = vld [vmem:[%s1071_s2 + $0x50] sm:$0xff] }
   0x5   :  { %v239_v11 = vld [vmem:[%s1071_s2 + $0x40] sm:$0xff]  ;;  %v79_v14 = vld [vmem:[%s1071_s2 + $0x10] sm:$0xff]  ;;  %v242_v15 = vld [vmem:[%s1071_s2 + $0x58] sm:$0xff] }
   0x6   :  { %45 = vxpose.xlu0.b32.end [2/2] (short) (narrow) %v43_v1, 8  ;;  %v400_v16 = vld [vmem:[%s1071_s2 + $0x70] sm:$0xff]  ;;  %v335_v17 = vld [vmem:[%s1071_s2 + $0x60] sm:$0xff]  ;;  %v336_v19 = vld [vmem:[%s1071_s2 + $0x68] sm:$0xff] }
   0x7   :  { %v402_v18 = vld [vmem:[%s1071_s2 + $0x80] sm:$0xff]  ;;  %v496_v20 = vld [vmem:[%s1071_s2 + $0x90] sm:$0xff]  ;;  %v401_v21 = vld [vmem:[%s1071_s2 + $0x78] sm:$0xff] }
   0x8   :  { %92 = vperm.xlu1 %866, %v78_v5   ;;  %v498_v22 = vld [vmem:[%s1071_s2 + $0xa0] sm:$0xff]  ;;  %v403_v23 = vld [vmem:[%s1071_s2 + $0x88] sm:$0xff]  ;;  %v500_v24 = vld [vmem:[%s1071_s2 + $0xb0] sm:$0xff] }
   0x9   :  { %v497_v25 = vld [vmem:[%s1071_s2 + $0x98] sm:$0xff]  ;;  %v502_v26 = vld [vmem:[%s1071_s2 + $0xc0] sm:$0xff]  ;;  %v499_v27 = vld [vmem:[%s1071_s2 + $0xa8] sm:$0xff] }
   0xa   :  { %v653_v28 = vld [vmem:[%s1071_s2 + $0xd0] sm:$0xff]  ;;  %v501_v29 = vld [vmem:[%s1071_s2 + $0xb8] sm:$0xff]  ;;  %v503_v30 = vld [vmem:[%s1071_s2 + $0xc8] sm:$0xff] }
   0xb   :  { %v869_v34 = vld [vmem:[%s1070_s1 + $0x8] sm:$0xff]   ;;  %v870_v35 = vld [vmem:[%s1070_s1 + $0x10] sm:$0xff]   ;;  %v871_v36 = vld [vmem:[%s1070_s1 + $0x18] sm:$0xff]  }
   0xc   :  { %102 = vperm.xlu1 %866, %v80_v6   ;;  %v872_v37 = vld [vmem:[%s1070_s1 + $0x20] sm:$0xff]  }
   0xd   :  { %820 = vmatprep.mubr.msk.bf16.mxu1 %vm273_vm2, %v872_v37 }
  0x10   :  { %107 = vperm.xlu1 %866, %v81_v7  }
  0x14   :  { %112 = vperm.xlu1 %866, %v82_v8  }
  0x18   :  { %117 = vperm.xlu1 %866, %v83_v9  }
  0x1c   :  { %122 = vperm.xlu1 %866, %v84_v10   ;;  %v873_v10 = vld [vmem:[%s1070_s1 + $0x28] sm:$0xff]  }
  0x20   :  { %245 = vperm.xlu1 %866, %v239_v11   ;;  %v886_v11 = vmov 0.0  }
  0x24   :  { %250 = vperm.xlu1 %866, %v240_v12  }
  0x28   :  { %255 = vperm.xlu1 %866, %v241_v13  }
  0x2c   :  { %260 = vperm.xlu1 %866, %v242_v15  }
  0x2f   :  { %867 = vset.pattern.permute.xlu0 %v885_v3 }
  0x30   :  { %97 = vperm.xlu0 %867, %v79_v14   ;;  %339 = vperm.xlu1 %866, %v335_v17  }
  0x34   :  { %406 = vperm.xlu0 %867, %v400_v16   ;;  %344 = vperm.xlu1 %866, %v336_v19  }
  0x38   :  { %416 = vperm.xlu0 %867, %v402_v18   ;;  %411 = vperm.xlu1 %866, %v401_v21  }
  0x3c   :  { %506 = vperm.xlu0 %867, %v496_v20   ;;  %421 = vperm.xlu1 %866, %v403_v23  }
  0x40   :  { %516 = vperm.xlu0 %867, %v498_v22   ;;  %511 = vperm.xlu1 %866, %v497_v25  }
  0x44   :  { %526 = vperm.xlu0 %867, %v500_v24   ;;  %521 = vperm.xlu1 %866, %v499_v27  }
  0x48   :  { %536 = vperm.xlu0 %867, %v502_v26   ;;  %531 = vperm.xlu1 %866, %v501_v29  }
  0x4c   :  { %656 = vperm.xlu0 %867, %v653_v28   ;;  %541 = vperm.xlu1 %866, %v503_v30   ;;  %v874_v30 = vld [vmem:[%s1070_s1 + $0x30] sm:$0xff]  }
  0x82   :  { %v60_v31 = vpop.trf.xlu0 }
  0x83   :  { %v76_v32 = vpack.c.bf16 %v60_v31, %v60_v31  ;;  %v88_v38 = vpop.permute.xlu1 %87  ;;  %v875_v31 = vld [vmem:[%s1070_s1 + $0x38] sm:$0xff]  }
  0x85   :  { %862 = vmatprep.subr.msk.bf16.mxu0 %vm158_vm1, %v76_v32  ;;  %v160_v33 = vsel %vm158_vm1, %v76_v32, 0 }
  0x86   :  { %803 = vmatpush3.bf16.msra.mxu0 %v160_v33 }
  0x87   :  { %v93_v39 = vpop.permute.xlu1 %92  ;;  %824 = vmatprep.subr.bf16.mxu0 %v886_v11 }
  0x89   :  { %805 = vmatmul.mubr.msk.bf16.vlgmr.msra.gmra.mrb[0].mxu0 %vm145_vm0, %v869_v34 }
  0x8a   :  { %808 = vmatprep.mubr.msk.bf16.mxu0 %vm145_vm0, %v870_v35 }
  0x8b   :  { %v103_v40 = vpop.permute.xlu1 %102 }
  0x8f   :  { %v108_v41 = vpop.permute.xlu1 %107 }
  0x91   :  { %809 = vmatmul.mubr.msk.bf16.gmra.mrb[4].mxu0 %vm145_vm0, %v871_v36 }
  0x92   :  { %828 = vmatprep.mubr.msk.bf16.mxu0 %vm887_vm3, %v886_v11 }
  0x93   :  { %v113_v42 = vpop.permute.xlu1 %112 }
  0x97   :  { %v118_v51 = vpop.permute.xlu1 %117 }
  0x9b   :  { %v123_v62 = vpop.permute.xlu1 %122 }
  0x9f   :  { %v246_v12 = vpop.permute.xlu1 %245 }
  0xa3   :  { %v251_v13 = vpop.permute.xlu1 %250 }
  0xa7   :  { %v256_v14 = vpop.permute.xlu1 %255 }
  0xab   :  { %v261_v18 = vpop.permute.xlu1 %260 }
  0xaf   :  { %v98_v43 = vpop.permute.xlu0 %97  ;;  %v340_v32 = vpop.permute.xlu1 %339 }
  0xb3   :  { %v345_v36 = vpop.permute.xlu1 %344 }
 0x15c   :  { %v806_v44 = vpop.f32.mrb[0].mxu0 }
 0x15d   :  { %v205_v45 = vadd.f32 %v806_v44, %v98_v43  ;;  %v196_v46 = vpop.f32.mrb[1].mxu0  ;;  %v876_v43 = vld [vmem:[%s1070_s1 + $0x40] sm:$0xff]   ;;  %v877_v44 = vld [vmem:[%s1070_s1 + $0x48] sm:$0xff]  }
 0x15e   :  { %v197_v47 = vadd.f32 %v196_v46, %v88_v38  ;;  %v807_v48 = vpop.f32.mrb[2].mxu0  ;;  %v412_v46 = vpop.permute.xlu1 %411 }
 0x15f   :  { %v208_v49 = vadd.f32 %v807_v48, %v103_v40  ;;  %v199_v50 = vpop.f32.mrb[3].mxu0  ;;  %v229_v53 = vmax.f32 %v205_v45, 0.0  ;;  %v407_v45 = vpop.permute.xlu0 %406 }
 0x160   :  { %v200_v52 = vadd.f32 %v199_v50, %v93_v39  ;;  %v227_v55 = vmax.f32 %v197_v47, 0.0 }
 0x161   :  { %v230_v54 = vmax.f32 %v208_v49, 0.0 }
 0x162   :  { %v228_v56 = vmax.f32 %v200_v52, 0.0 }
 0x163   :  { %v236_v57 = vpack.c.bf16 %v230_v54, %v229_v53  ;;  %v417_v47 = vpop.permute.xlu0 %416 }
 0x164   :  { %v810_v58 = vpop.f32.mrb[4].mxu0  ;;  %v235_v59 = vpack.c.bf16 %v228_v56, %v227_v55 }
 0x165   :  { %v221_v60 = vadd.f32 %v810_v58, %v118_v51  ;;  %v212_v61 = vpop.f32.mrb[5].mxu0  ;;  %v422_v51 = vpop.permute.xlu1 %421 }
 0x166   :  { %v213_v63 = vadd.f32 %v212_v61, %v108_v41  ;;  %v811_v0 = vpop.f32.mrb[6].mxu0  ;;  %812 = vmatprep.subr.bf16.mxu1 %v235_v59 }
 0x167   :  { %v224_v1 = vadd.f32 %v811_v0, %v123_v62  ;;  %v215_v2 = vpop.f32.mrb[7].mxu0  ;;  %813 = vmatpush3.bf16.msra.mxu1 %v235_v59  ;;  %v233_v4 = vmax.f32 %v221_v60, 0.0  ;;  %v879_v0 = vld [vmem:[%s1070_s1 + $0x58] sm:$0xff]  }
 0x168   :  { %v216_v3 = vadd.f32 %v215_v2, %v113_v42  ;;  %814 = vmatprep.subr.bf16.mxu1 %v236_v57  ;;  %v231_v6 = vmax.f32 %v213_v63, 0.0  ;;  %v878_v63 = vld [vmem:[%s1070_s1 + $0x50] sm:$0xff]   ;;  %v507_v2 = vpop.permute.xlu0 %506 }
 0x169   :  { %v234_v5 = vmax.f32 %v224_v1, 0.0  ;;  %v880_v1 = vld [vmem:[%s1070_s1 + $0x60] sm:$0xff]  }
 0x16a   :  { %v232_v7 = vmax.f32 %v216_v3, 0.0  ;;  %v512_v3 = vpop.permute.xlu1 %511 }
 0x16b   :  { %v238_v8 = vpack.c.bf16 %v234_v5, %v233_v4  ;;  %815 = vmatpush3.bf16.msra.mxu1 %v236_v57 }
 0x16c   :  { %v237_v9 = vpack.c.bf16 %v232_v7, %v231_v6  ;;  %v517_v4 = vpop.permute.xlu0 %516 }
 0x16e   :  { %816 = vmatprep.subr.bf16.mxu1 %v237_v9  ;;  %v522_v5 = vpop.permute.xlu1 %521 }
 0x16f   :  { %817 = vmatpush3.bf16.msra.mxu1 %v237_v9 }
 0x170   :  { %818 = vmatprep.subr.bf16.mxu1 %v238_v8  ;;  %v527_v9 = vpop.permute.xlu0 %526 }
 0x173   :  { %819 = vmatpush3.bf16.msra.mxu1 %v238_v8 }
 0x176   :  { %821 = vmatmul.mubr.msk.bf16.vlgmr.msra.gmra.mrb[0].mxu1 %vm273_vm2, %v873_v10 }
 0x177   :  { %834 = vmatprep.mubr.msk.bf16.mxu1 %vm434_vm5, %v875_v31 }
 0x249   :  { %v822_v15 = vpop.f32.mrb[0].mxu1 }
 0x24a   :  { %v323_v16 = vadd.f32 %v822_v15, %v256_v14  ;;  %v314_v17 = vpop.f32.mrb[1].mxu1  ;;  %v532_v15 = vpop.permute.xlu1 %531 }
 0x24b   :  { %v315_v19 = vadd.f32 %v314_v17, %v246_v12  ;;  %v823_v20 = vpop.f32.mrb[2].mxu1 }
 0x24c   :  { %v326_v21 = vadd.f32 %v823_v20, %v261_v18  ;;  %v317_v22 = vpop.f32.mrb[3].mxu1  ;;  %v331_v24 = vmax.f32 %v323_v16, 0.0 }
 0x24d   :  { %v318_v23 = vadd.f32 %v317_v22, %v251_v13  ;;  %v329_v26 = vmax.f32 %v315_v19, 0.0  ;;  %v537_v22 = vpop.permute.xlu0 %536 }
 0x24e   :  { %v332_v25 = vmax.f32 %v326_v21, 0.0 }
 0x24f   :  { %v330_v27 = vmax.f32 %v318_v23, 0.0 }
 0x250   :  { %v334_v28 = vpack.c.bf16 %v332_v25, %v331_v24 }
 0x251   :  { %v333_v29 = vpack.c.bf16 %v330_v27, %v329_v26  ;;  %v542_v27 = vpop.permute.xlu1 %541 }
 0x253   :  { %825 = vmatpush3.bf16.msra.mxu0 %v333_v29 }
 0x254   :  { %826 = vmatprep.subr.bf16.mxu0 %v886_v11 }
 0x257   :  { %827 = vmatpush3.bf16.msra.mxu0 %v334_v28 }
 0x25a   :  { %829 = vmatmul.mubr.msk.bf16.vlgmr.msra.gmra.mrb[8].mxu0 %vm352_vm4, %v874_v30 }
 0x25b   :  { %842 = vmatprep.mubr.msk.bf16.mxu0 %vm352_vm4, %v877_v44 }
 0x32d   :  { %v390_v33 = vpop.f32.mrb[8].mxu0 }
 0x32e   :  { %v391_v34 = vadd.f32 %v390_v33, %v340_v32  ;;  %v830_v35 = vpop.f32.mrb[9].mxu0 }
 0x32f   :  { %v393_v37 = vpop.f32.mrb[10].mxu0 }
 0x330   :  { %v394_v38 = vadd.f32 %v393_v37, %v345_v36  ;;  %v831_v39 = vpop.f32.mrb[11].mxu0  ;;  %v397_v40 = vmax.f32 %v391_v34, 0.0 }
 0x331   :  { %v41_v39 = vld [vmem:[%s1070_s1 + $0x68] sm:$0xf] }
 0x332   :  { %v398_v41 = vmax.f32 %v394_v38, 0.0 }
 0x334   :  { %v399_v42 = vpack.c.bf16 %v398_v41, %v397_v40  ;;  %v657_v40 = vpop.permute.xlu0 %656 }
 0x336   :  { %832 = vmatprep.subr.bf16.mxu1 %v399_v42 }
 0x337   :  { %833 = vmatpush3.bf16.msra.mxu1 %v399_v42 }
 0x338   :  { %850 = vmatprep.subr.bf16.mxu1 %v886_v11 }
 0x33a   :  { %835 = vmatmul.mubr.msk.bf16.vlgmr.msra.gmra.mrb[4].mxu1 %vm434_vm5, %v876_v43 }
 0x33b   :  { %858 = vmatprep.mubr.msk.bf16.mxu1 %vm887_vm3, %v886_v11 }
 0x40d   :  { %v836_v48 = vpop.f32.mrb[4].mxu1 }
 0x40e   :  { %v484_v49 = vadd.f32 %v836_v48, %v417_v47  ;;  %v475_v50 = vpop.f32.mrb[5].mxu1 }
 0x40f   :  { %v476_v52 = vadd.f32 %v475_v50, %v407_v45  ;;  %v837_v53 = vpop.f32.mrb[6].mxu1 }
 0x410   :  { %v487_v54 = vadd.f32 %v837_v53, %v422_v51  ;;  %v478_v55 = vpop.f32.mrb[7].mxu1  ;;  %v492_v57 = vmax.f32 %v484_v49, 0.0 }
 0x411   :  { %v479_v56 = vadd.f32 %v478_v55, %v412_v46  ;;  %v490_v59 = vmax.f32 %v476_v52, 0.0 }
 0x412   :  { %v493_v58 = vmax.f32 %v487_v54, 0.0 }
 0x413   :  { %v491_v60 = vmax.f32 %v479_v56, 0.0 }
 0x414   :  { %v495_v61 = vpack.c.bf16 %v493_v58, %v492_v57 }
 0x415   :  { %v494_v62 = vpack.c.bf16 %v491_v60, %v490_v59 }
 0x417   :  { %838 = vmatprep.subr.bf16.mxu0 %v494_v62 }
 0x418   :  { %839 = vmatpush3.bf16.msra.mxu0 %v494_v62 }
 0x419   :  { %840 = vmatprep.subr.bf16.mxu0 %v495_v61 }
 0x41c   :  { %841 = vmatpush3.bf16.msra.mxu0 %v495_v61 }
 0x41f   :  { %843 = vmatmul.mubr.msk.bf16.vlgmr.msra.gmra.mrb[12].mxu0 %vm352_vm4, %v878_v63 }
 0x420   :  { %846 = vmatprep.mubr.msk.bf16.mxu0 %vm352_vm4, %v879_v0 }
 0x427   :  { %847 = vmatmul.mubr.msk.bf16.gmra.mrb[16].mxu0 %vm352_vm4, %v880_v1 }
 0x4f2   :  { %v844_v6 = vpop.f32.mrb[12].mxu0 }
 0x4f3   :  { %v619_v7 = vadd.f32 %v844_v6, %v517_v4  ;;  %v610_v8 = vpop.f32.mrb[13].mxu0 }
 0x4f4   :  { %v611_v10 = vadd.f32 %v610_v8, %v507_v2  ;;  %v845_v12 = vpop.f32.mrb[14].mxu0 }
 0x4f5   :  { %v622_v13 = vadd.f32 %v845_v12, %v522_v5  ;;  %v613_v14 = vpop.f32.mrb[15].mxu0  ;;  %v643_v17 = vmax.f32 %v619_v7, 0.0 }
 0x4f6   :  { %v614_v16 = vadd.f32 %v613_v14, %v512_v3  ;;  %v641_v19 = vmax.f32 %v611_v10, 0.0 }
 0x4f7   :  { %v644_v18 = vmax.f32 %v622_v13, 0.0 }
 0x4f8   :  { %v642_v20 = vmax.f32 %v614_v16, 0.0 }
 0x4f9   :  { %v650_v21 = vpack.c.bf16 %v644_v18, %v643_v17 }
 0x4fa   :  { %v649_v23 = vpack.c.bf16 %v642_v20, %v641_v19  ;;  %v848_v24 = vpop.f32.mrb[16].mxu0 }
 0x4fb   :  { %v635_v25 = vadd.f32 %v848_v24, %v537_v22  ;;  %v626_v26 = vpop.f32.mrb[17].mxu0 }
 0x4fc   :  { %v627_v28 = vadd.f32 %v626_v26, %v527_v9  ;;  %v849_v29 = vpop.f32.mrb[18].mxu0  ;;  %851 = vmatpush3.bf16.msra.mxu1 %v649_v23 }
 0x4fd   :  { %v638_v30 = vadd.f32 %v849_v29, %v542_v27  ;;  %v629_v31 = vpop.f32.mrb[19].mxu0  ;;  %852 = vmatprep.subr.bf16.mxu1 %v886_v11  ;;  %v647_v33 = vmax.f32 %v635_v25, 0.0 }
 0x4fe   :  { %v630_v32 = vadd.f32 %v629_v31, %v532_v15  ;;  %v645_v35 = vmax.f32 %v627_v28, 0.0 }
 0x4ff   :  { %v648_v34 = vmax.f32 %v638_v30, 0.0 }
 0x500   :  { %v646_v36 = vmax.f32 %v630_v32, 0.0  ;;  %853 = vmatpush3.bf16.msra.mxu1 %v650_v21 }
 0x501   :  { %v652_v37 = vpack.c.bf16 %v648_v34, %v647_v33  ;;  %854 = vmatprep.subr.bf16.mxu1 %v886_v11 }
 0x502   :  { %v651_v38 = vpack.c.bf16 %v646_v36, %v645_v35 }
 0x504   :  { %855 = vmatpush3.bf16.msra.mxu1 %v651_v38 }
 0x505   :  { %856 = vmatprep.subr.bf16.mxu1 %v886_v11 }
 0x508   :  { %857 = vmatpush3.bf16.msra.mxu1 %v652_v37 }
 0x50b   :  { %859 = vmatmul.mubr.msk.bf16.vlgmr.msra.gmra.mrb[8].mxu1 %vm273_vm2, %v41_v39 }
 0x5de   :  { %v696_v41 = vpop.f32.mrb[8].mxu1 }
 0x5df   :  { %v697_v42 = vadd.f32 %v696_v41, %v657_v40  ;;  %v860_v43 = vpop.f32.mrb[9].mxu1 }
 0x5e0   :  { %v699_v44 = vpop.f32.mrb[10].mxu1 }
 0x5e1   :  { %v773_v45 = vmul.f32 -1.442695, %v697_v42  ;;  %v861_v46 = vpop.f32.mrb[11].mxu1 }
 0x5e3   :  { %881 = vpow2.f32 %v773_v45 }
 0x5ed   :  { %v882_v47 = vpop.eup %881 }
 0x5ee   :  { %v705_v48 = vadd.f32 1.0, %v882_v47 }
 0x5f0   :  { %883 = vrcp.f32 %v705_v48 }
 0x5fa   :  { %v884_v49 = vpop.eup %883 }
 0x5fb   :  { %708 = vxpose.xlu1.b32.start.end [1/1] (short) (narrow) %v884_v49, 16 }
 0x67b   :  { %v724_v11 = vpop.trf.xlu1 }
 0x67c   :  { %740 = vst.msk [vmem:[%s1072_s3] sm:$0xff] %vm145_vm0, %v724_v11 }
 0x67f   :  { %v725_v50 = vpop.trf.xlu1 }
 0x680   :  { %741 = vst.msk [vmem:[%s1072_s3 + $0x8] sm:$0xff] %vm145_vm0, %v725_v50 }

</bundles_post_ra>
